<compile_context>
chip_gen: v7x
topology: tpu7x:2x2x1
jax: 0.10.0
libtpu: 0.0.40
codegen_flags: <defaults>
</compile_context>

<pallas_src>
import jax
import jax.numpy as jnp
from jax.experimental import pallas as pl
from jax.experimental.pallas import tpu as pltpu


def gca_kernel(x_ref, wm_ref, w1t_ref, w2t_ref, o_ref):
    x = x_ref[...]                      # (Bt, C, HW) float32
    wm = wm_ref[...]                    # (C, 1)   context-mask 1x1-conv weight
    w1t = w1t_ref[...]                  # (C, Cr)  mlp conv1 weight, transposed
    w2t = w2t_ref[...]                  # (Cr, C)  mlp conv2 weight, transposed

    # context_mask: 1x1 conv (C -> 1) at every spatial position.
    # logits[b, p] = sum_c x[b, c, p] * wm[c]   (VPU mul + sublane reduce)
    logits = jnp.sum(x * wm[None, :, :], axis=1)                    # (Bt, HW)

    # Softmax over the spatial dim (PyTorch Softmax(dim=2) on (b, 1, h*w)).
    # Keep it un-normalised; fold 1/denom into the tiny context vector.
    m = jnp.max(logits, axis=-1, keepdims=True)                     # (Bt, 1)
    e = jnp.exp(logits - m)                                         # (Bt, HW)
    denom = jnp.sum(e, axis=-1, keepdims=True)                      # (Bt, 1)
    inv_denom = pl.reciprocal(denom, approx=False)                  # tiny; exact

    # context[b, c] = (sum_p e[b, p] * x[b, c, p]) / denom[b]
    # VPU multiply + lane reduce; an M=1 batched MXU einsum gives negligible
    # MXU utilisation and risks a full-block relayout (per review).
    context = jnp.sum(x * e[:, None, :], axis=-1) * inv_denom       # (Bt, C)

    # mlp: conv1x1 -> relu -> conv1x1, lane-major row-vector matmuls.
    hidden = jnp.maximum(
        jnp.dot(context, w1t, preferred_element_type=jnp.float32), 0.0)   # (Bt, Cr)
    ctx_out = jnp.dot(hidden, w2t, preferred_element_type=jnp.float32)    # (Bt, C)

    # Residual broadcast add over spatial positions.
    o_ref[...] = x + ctx_out[:, :, None].astype(x.dtype)            # (Bt, C, HW)


def _tpu_info():
    """(tensorcores_per_chip, vmem_capacity_bytes), with safe fallbacks."""
    kind = ""
    try:
        kind = jax.devices()[0].device_kind.lower()
    except Exception:
        pass
    num_cores = 2 if "v7" in kind else 1
    vmem_cap = (64 << 20) if "v7" in kind else (128 << 20)
    try:
        vmem_cap = int(pltpu.get_tpu_info().vmem_capacity_bytes)
    except Exception:
        pass
    return num_cores, vmem_cap


def _choose_bt(b, c, hw, itemsize, num_cores, vmem_cap):
    """Pick the batch tile Bt for this HBM-bound kernel (see header)."""
    per_b = max(1, c * hw * itemsize)

    # ~4 MiB x/out blocks: tile sweeps show >=85% of HBM roofline there and the
    # ~0.35 us fixed per-grid-step cost amortises over a long DMA.
    bt = max(1, min(b, (4 << 20) // per_b))

    if num_cores >= 2 and b >= num_cores:
        # v7x: want >= ~2 steps per core so both cores pipeline, but never
        # shrink blocks below ~512 KiB.
        steps_bt = max(1, b // min(b, 2 * num_cores))
        floor_bt = max(1, (512 << 10) // per_b)
        bt = min(bt, max(steps_bt, floor_bt))

    # VMEM budget: 85% of physical minus fixed headroom, covering
    # double-buffered in/out blocks (4x) plus ~2 block-sized compute
    # temporaries (broadcast mul before the reductions).
    budget = int(vmem_cap * 0.85) - (8 << 20)
    bt = max(1, min(bt, b, max(1, budget) // (6 * per_b) if budget > 0 else 1))
    return bt


def gca_forward(x_nchw, w_mask, w1, w2):
    """x_nchw: (b, c, h, w) float32. Weights follow nn.Conv2d 1x1 layouts:
       w_mask: (1, c), w1: (c//r, c), w2: (c, c//r)."""
    b, c, h, w = x_nchw.shape
    hw = h * w

    # No HW padding: block last dim equals the full hw (BlockSpec full-dim
    # rule); Mosaic masks the ragged lane tail, saving two HBM passes.
    x = x_nchw.reshape(b, c, hw)

    # Pre-transpose the 1x1-conv weights so the in-kernel MLP is lane-major.
    wm_col = jnp.transpose(w_mask)              # (c, 1)
    w1t = jnp.transpose(w1)                     # (c, c//r)
    w2t = jnp.transpose(w2)                     # (c//r, c)

    itemsize = jnp.dtype(x.dtype).itemsize
    num_cores, vmem_cap = _tpu_info()
    bt = _choose_bt(b, c, hw, itemsize, num_cores, vmem_cap)
    num_blocks = pl.cdiv(b, bt)                 # ragged final batch block OK

    # TODO(synk): for very large C*HW where even a single-batch block exceeds
    # the VMEM budget (e.g. C>=256, HW>=12K f32 on v7x's 64 MiB VMEM), add an
    # HW grid axis with a two-pass / online-softmax scheme instead of growing
    # the block.
    # TODO(synk): optionally run x/out in bf16 (f32 softmax/context inside)
    # and donate x via input_output_aliases if the caller allows it; the
    # kernel is HBM-bandwidth bound so this roughly halves wall time.
    block_bytes = bt * c * hw * itemsize
    weight_bytes = (wm_col.size + w1t.size + w2t.size) * itemsize
    need = 6 * block_bytes + 2 * weight_bytes + (8 << 20)
    vmem_limit = int(min(int(vmem_cap * 0.85), max(32 << 20, need)))

    out = pl.pallas_call(
        gca_kernel,
        out_shape=jax.ShapeDtypeStruct((b, c, hw), x.dtype),
        grid_spec=pltpu.PrefetchScalarGridSpec(
            num_scalar_prefetch=0,
            grid=(num_blocks,),
            in_specs=[
                pl.BlockSpec((bt, c, hw), lambda i: (i, 0, 0)),
                pl.BlockSpec(wm_col.shape, lambda i: (0, 0)),
                pl.BlockSpec(w1t.shape, lambda i: (0, 0)),
                pl.BlockSpec(w2t.shape, lambda i: (0, 0)),
            ],
            out_specs=pl.BlockSpec((bt, c, hw), lambda i: (i, 0, 0)),
        ),
        compiler_params=pltpu.CompilerParams(
            dimension_semantics=("parallel",),
            vmem_limit_bytes=vmem_limit),
    )(x, wm_col, w1t, w2t)

    return out.reshape(b, c, h, w)


def gca_reference(x_nchw, w_mask, w1, w2):
    """Pure-JAX reference mirroring the PyTorch forward."""
    b, c, h, w = x_nchw.shape
    hw = h * w
    x = x_nchw.reshape(b, c, hw)                                  # (b, c, hw)
    logits = jnp.einsum("oc,bcp->bop", w_mask, x)                 # (b, 1, hw)
    attn = jax.nn.softmax(logits, axis=2)                         # (b, 1, hw)
    context = jnp.einsum("bcp,bop->bc", x, attn)                  # (b, c)
    hidden = jax.nn.relu(jnp.einsum("rc,bc->br", w1, context))    # (b, c//r)
    ctx_out = jnp.einsum("cr,br->bc", w2, hidden)                 # (b, c)
    return x_nchw + ctx_out[:, :, None, None]


if __name__ == "__main__":
    key = jax.random.PRNGKey(0)
    k_x, k_m, k_1, k_2 = jax.random.split(key, 4)

    # Small shapes consistent with GCA(dim=32, reduction=8)
    B, C, H, W = 2, 32, 16, 16
    R = 8
    Cr = C // R

    x = jax.random.normal(k_x, (B, C, H, W), dtype=jnp.float32)
    # Deterministic synthetic 1x1-conv weights (bias=False in the module).
    w_mask = jax.random.normal(k_m, (1, C), dtype=jnp.float32) * (1.0 / C) ** 0.5
    w1 = jax.random.normal(k_1, (Cr, C), dtype=jnp.float32) * (1.0 / C) ** 0.5
    w2 = jax.random.normal(k_2, (C, Cr), dtype=jnp.float32) * (1.0 / Cr) ** 0.5

    out = gca_forward(x, w_mask, w1, w2)
    out = jax.block_until_ready(out)

    ref = gca_reference(x, w_mask, w1, w2)
    assert out.shape == (B, C, H, W)
    assert jnp.allclose(out, ref, atol=1e-5, rtol=1e-5)

    print("KERNEL_OK")
</pallas_src>

<mosaic_0001>
module attributes {stable_mosaic.version = 11 : i64} {
  func.func @gca_kernel(%arg0: i32, %arg1: memref<2x32x256xf32, #tpu.memory_space<vmem>>, %arg2: memref<32x1xf32, #tpu.memory_space<vmem>>, %arg3: memref<32x4xf32, #tpu.memory_space<vmem>>, %arg4: memref<4x32xf32, #tpu.memory_space<vmem>>, %arg5: memref<2x32x256xf32, #tpu.memory_space<vmem>>) attributes {dimension_semantics = [#tpu.dimension_semantics<parallel>], iteration_bounds = array<i64: 1>, scalar_prefetch = 0 : i64, scratch_operands = 0 : i64, tpu.core_type = #tpu.core_type<tc>, window_params = [{transform_indices = @transform_0, window_bounds = array<i64: 2, 32, 256>}, {pipeline_mode = #tpu.pipeline_mode<synchronous>, transform_indices = @transform_1, window_bounds = array<i64: 32, 1>}, {pipeline_mode = #tpu.pipeline_mode<synchronous>, transform_indices = @transform_2, window_bounds = array<i64: 32, 4>}, {pipeline_mode = #tpu.pipeline_mode<synchronous>, transform_indices = @transform_3, window_bounds = array<i64: 4, 32>}, {transform_indices = @transform_4, window_bounds = array<i64: 2, 32, 256>}]} {
    %c0 = arith.constant 0 : index
    %c0_0 = arith.constant 0 : index
    %c0_1 = arith.constant 0 : index
    %0 = vector.load %arg1[%c0, %c0_0, %c0_1] : memref<2x32x256xf32, #tpu.memory_space<vmem>>, vector<2x32x256xf32>
    %c0_2 = arith.constant 0 : index
    %c0_3 = arith.constant 0 : index
    %1 = vector.load %arg2[%c0_2, %c0_3] : memref<32x1xf32, #tpu.memory_space<vmem>>, vector<32x1xf32>
    %c0_4 = arith.constant 0 : index
    %c0_5 = arith.constant 0 : index
    %2 = vector.load %arg3[%c0_4, %c0_5] : memref<32x4xf32, #tpu.memory_space<vmem>>, vector<32x4xf32>
    %c0_6 = arith.constant 0 : index
    %c0_7 = arith.constant 0 : index
    %3 = vector.load %arg4[%c0_6, %c0_7] : memref<4x32xf32, #tpu.memory_space<vmem>>, vector<4x32xf32>
    %4 = vector.shape_cast %1 : vector<32x1xf32> to vector<1x32x1xf32>
    %5 = vector.broadcast %4 : vector<1x32x1xf32> to vector<2x32x256xf32>
    %6 = arith.mulf %0, %5 : vector<2x32x256xf32>
    %cst = arith.constant dense<0.000000e+00> : vector<2x256xf32>
    %7 = vector.multi_reduction <add>, %6, %cst [1] : vector<2x32x256xf32> to vector<2x256xf32>
    %cst_8 = arith.constant dense<0xFF800000> : vector<2xf32>
    %8 = vector.multi_reduction <maximumf>, %7, %cst_8 [1] : vector<2x256xf32> to vector<2xf32>
    %9 = vector.shape_cast %8 : vector<2xf32> to vector<2x1xf32>
    %10 = vector.broadcast %9 : vector<2x1xf32> to vector<2x256xf32>
    %11 = arith.subf %7, %10 : vector<2x256xf32>
    %12 = math.exp %11 : vector<2x256xf32>
    %cst_9 = arith.constant dense<0.000000e+00> : vector<2xf32>
    %13 = vector.multi_reduction <add>, %12, %cst_9 [1] : vector<2x256xf32> to vector<2xf32>
    %14 = vector.shape_cast %13 : vector<2xf32> to vector<2x1xf32>
    %15 = tpu.reciprocal %14 : vector<2x1xf32> -> vector<2x1xf32>
    %16 = vector.shape_cast %12 : vector<2x256xf32> to vector<2x1x256xf32>
    %17 = vector.broadcast %16 : vector<2x1x256xf32> to vector<2x32x256xf32>
    %18 = arith.mulf %0, %17 : vector<2x32x256xf32>
    %cst_10 = arith.constant dense<0.000000e+00> : vector<2x32xf32>
    %19 = vector.multi_reduction <add>, %18, %cst_10 [2] : vector<2x32x256xf32> to vector<2x32xf32>
    %20 = vector.broadcast %15 : vector<2x1xf32> to vector<2x32xf32>
    %21 = arith.mulf %19, %20 : vector<2x32xf32>
    %cst_11 = arith.constant dense<0.000000e+00> : vector<2x4xf32>
    %22 = tpu.matmul %21, %2, %cst_11 {dimension_numbers = #tpu.dot_dimension_numbers<[1], [0], [0], [1], [0, 0, 1, 1], [], []>} : vector<2x32xf32>, vector<32x4xf32>, vector<2x4xf32> -> vector<2x4xf32>
    %cst_12 = arith.constant 0.000000e+00 : f32
    %23 = vector.broadcast %cst_12 : f32 to vector<2x4xf32>
    %24 = arith.maximumf %22, %23 : vector<2x4xf32>
    %cst_13 = arith.constant dense<0.000000e+00> : vector<2x32xf32>
    %25 = tpu.matmul %24, %3, %cst_13 {dimension_numbers = #tpu.dot_dimension_numbers<[1], [0], [0], [1], [0, 0, 1, 1], [], []>} : vector<2x4xf32>, vector<4x32xf32>, vector<2x32xf32> -> vector<2x32xf32>
    %26 = vector.shape_cast %25 : vector<2x32xf32> to vector<2x32x1xf32>
    %27 = vector.broadcast %26 : vector<2x32x1xf32> to vector<2x32x256xf32>
    %28 = arith.addf %0, %27 : vector<2x32x256xf32>
    %c0_14 = arith.constant 0 : index
    %c0_15 = arith.constant 0 : index
    %c0_16 = arith.constant 0 : index
    %29 = vector.load %arg5[%c0_14, %c0_15, %c0_16] : memref<2x32x256xf32, #tpu.memory_space<vmem>>, vector<2x32x256xf32>
    tpu.vector_store %arg5[%c0_14, %c0_15, %c0_16], %28 {strides = array<i32>} : memref<2x32x256xf32, #tpu.memory_space<vmem>>, vector<2x32x256xf32>,
    return
  }
  func.func @transform_0(%arg0: i32) -> (i32, i32, i32) {
    %c0_i32 = arith.constant 0 : i32
    %c0_i32_0 = arith.constant 0 : i32
    %c0_i32_1 = arith.constant 0 : i32
    return %arg0, %c0_i32, %c0_i32_0 : i32, i32, i32
  }
  func.func @transform_1(%arg0: i32) -> (i32, i32) {
    %c0_i32 = arith.constant 0 : i32
    %c0_i32_0 = arith.constant 0 : i32
    %c0_i32_1 = arith.constant 0 : i32
    return %c0_i32, %c0_i32_0 : i32, i32
  }
  func.func @transform_2(%arg0: i32) -> (i32, i32) {
    %c0_i32 = arith.constant 0 : i32
    %c0_i32_0 = arith.constant 0 : i32
    %c0_i32_1 = arith.constant 0 : i32
    return %c0_i32, %c0_i32_0 : i32, i32
  }
  func.func @transform_3(%arg0: i32) -> (i32, i32) {
    %c0_i32 = arith.constant 0 : i32
    %c0_i32_0 = arith.constant 0 : i32
    %c0_i32_1 = arith.constant 0 : i32
    return %c0_i32, %c0_i32_0 : i32, i32
  }
  func.func @transform_4(%arg0: i32) -> (i32, i32, i32) {
    %c0_i32 = arith.constant 0 : i32
    %c0_i32_0 = arith.constant 0 : i32
    %c0_i32_1 = arith.constant 0 : i32
    return %arg0, %c0_i32, %c0_i32_0 : i32, i32, i32
  }
}

</mosaic_0001>

<bundles_post_ra>
// kernel: tpu_custom_call.1
= control target key start
LH: loop header
LB: loop body
LE: loop exit
PB: predicated region body
PF: predicated region fallthrough
CT: control target
= control target key end

     0   :  { %9 = vsyncpa [#allocation3], 0  ;;  %s870_s0 = inlined_call_operand.hbm [shape: f32[2,32,256], index: 0, kind: input, shape index: {}]   ;;  %s871_s1 = inlined_call_operand.vmem [shape: f32[32,1], index: 1, kind: input, shape index: {}]   ;;  %s872_s2 = inlined_call_operand.vmem [shape: f32[32,4], index: 2, kind: input, shape index: {}]   ;;  %s873_s3 = inlined_call_operand.vmem [shape: f32[4,32], index: 3, kind: input, shape index: {}]   ;;  %s874_s4 = inlined_call_operand.hbm [shape: f32[2,32,256], index: 4, kind: output, shape index: {}]  }
   0x1   :  { %10 = vsyncpa [#allocation4], 0  ;;  %s669_s15 = smov [#allocation2]   ;;  %s621_s19 = scalar_lea.hbm %s870_s0, 2048 }
   0x2   :  { %s16_s16 = sshll.u32 %s669_s15, 4  ;;  %p622_p0 = scmp.ne.s32.totalorder %s870_s0, %s621_s19  ;;  %s17_s16 = int_to_ptr.vmem [resolvable:$true] %s16_s16 }
   0x3   :  { %p625_p1 = scmp.lt.u32.totalorder %s621_s19, %s870_s0 }
   0x5   :  { %p627_p2 = pnand %p625_p1, %p622_p0 }
   0x7   :  { %630 = shalt.err (!%p627_p2)
}
   0x8   :  { %s631_s24 = scalar_lea.vmem %s17_s16, 2048  ;;  %p636_p4 = scmp.lt.s32.totalorder %s17_s16, %s17_s16 }
   0x9   :  { %p632_p3 = scmp.ne.s32.totalorder %s17_s16, %s631_s24  ;;  %p637_p5 = scmp.lt.s32.totalorder %s631_s24, %s631_s24 }
   0xb   :  { %p638_p6 = por %p637_p5, %p636_p4 }
   0xd   :  { %p639_p7 = pnand %p638_p6, %p632_p3 }
   0xf   :  { %642 = shalt.err (!%p639_p7)
}
  0x10   :  { %s670_s25 = smov 256   ;;  %s671_s26 = smov 16  }
  0x11   :  { %22 = dma.hbm_to_vmem [thread:$0]  %s870_s0, 2048, %s17_s16, [#allocation3], %s670_s25, %s670_s25, %s671_s26  }
  0x12   :  { %665 = dma.done.wait [#allocation3], 2048  }
  0x13   :  { %666 = vsyncadd [#allocation3], 4294965248  ;;  %v672_v0 = vmov 0   ;;  %v50_v1 = vld [vmem:[%s871_s1 + $0x10] sm:$0xff]  ;;  %v48_v2 = vld [vmem:[%s871_s1] sm:$0xff]  ;;  %vm133_vm0 = vcmask 1041409  }
  0x14   :  { %610 = vset.pattern.permute.xlu1 %v672_v0  ;;  %609 = vset.pattern.permute.xlu0 %v672_v0  ;;  %v51_v3 = vld [vmem:[%s871_s1 + $0x18] sm:$0xff]  ;;  %v49_v4 = vld [vmem:[%s871_s1 + $0x8] sm:$0xff]  ;;  %v729_v7 = vld [vmem:[#allocation2] sm:$0xff]  ;;  %vm138_vm1 = vcmask 1041408   ;;  %vm674_vm2 = vmmov 0   ;;  %vm294_vm3 = vcmask 130112  }
  0x15   :  { %69 = vperm.xlu1 %610, %v50_v1   ;;  %59 = vperm.xlu0 %609, %v48_v2   ;;  %v731_v8 = vld [vmem:[#allocation2 + $0x8] sm:$0xff]  ;;  %v733_v9 = vld [vmem:[#allocation2 + $0x20] sm:$0xff]  ;;  %v739_v12 = vld [vmem:[#allocation2 + $0x10] sm:$0xff]  ;;  %vm301_vm4 = vcmask 195712   ;;  %vm308_vm5 = vcmask 261312   ;;  %vm330_vm6 = vcmask 261120  }
  0x16   :  { %v735_v10 = vld [vmem:[#allocation2 + $0x40] sm:$0xff]  ;;  %v737_v11 = vld [vmem:[#allocation2 + $0x48] sm:$0xff]  ;;  %v741_v13 = vld [vmem:[#allocation2 + $0x18] sm:$0xff]  ;;  %vm408_vm7 = vcmask 1043456   ;;  %vm404_vm8 = vcmask 31744  }
  0x17   :  { %v743_v14 = vld [vmem:[#allocation2 + $0x50] sm:$0xff]  ;;  %v745_v15 = vld [vmem:[#allocation2 + $0x58] sm:$0xff]  ;;  %v747_v16 = vld [vmem:[#allocation2 + $0x28] sm:$0xff] }
  0x18   :  { %v749_v17 = vld [vmem:[#allocation2 + $0x60] sm:$0xff]  ;;  %v751_v18 = vld [vmem:[#allocation2 + $0x68] sm:$0xff]  ;;  %v757_v24 = vld [vmem:[#allocation2 + $0x30] sm:$0xff] }
  0x19   :  { %74 = vperm.xlu1 %610, %v51_v3   ;;  %64 = vperm.xlu0 %609, %v49_v4   ;;  %v759_v26 = vld [vmem:[#allocation2 + $0x38] sm:$0xff]  ;;  %v761_v27 = vld [vmem:[#allocation2 + $0x70] sm:$0xff] }
  0x1a   :  { %v763_v28 = vld [vmem:[#allocation2 + $0x78] sm:$0xff] }
  0x94   :  { %v70_v5 = vpop.permute.xlu1 %69  ;;  %v60_v6 = vpop.permute.xlu0 %59 }
  0x95   :  { %v77_v20 = vmul.f32 %v60_v6, %v729_v7  ;;  %v78_v21 = vmul.f32 %v60_v6, %v731_v8  ;;  %v85_v22 = vmul.f32 %v60_v6, %v735_v10  ;;  %v86_v23 = vmul.f32 %v60_v6, %v737_v11 }
  0x96   :  { %v81_v33 = vmul.f32 %v70_v5, %v733_v9  ;;  %v82_v34 = vmul.f32 %v70_v5, %v747_v16  ;;  %v89_v35 = vmul.f32 %v70_v5, %v749_v17  ;;  %v90_v36 = vmul.f32 %v70_v5, %v751_v18 }
  0x98   :  { %v65_v19 = vpop.permute.xlu0 %64  ;;  %v75_v25 = vpop.permute.xlu1 %74 }
  0x99   :  { %v79_v29 = vmul.f32 %v65_v19, %v739_v12  ;;  %v80_v30 = vmul.f32 %v65_v19, %v741_v13  ;;  %v87_v31 = vmul.f32 %v65_v19, %v743_v14  ;;  %v88_v32 = vmul.f32 %v65_v19, %v745_v15 }
  0x9a   :  { %v83_v41 = vmul.f32 %v75_v25, %v757_v24  ;;  %v84_v42 = vmul.f32 %v75_v25, %v759_v26  ;;  %v91_v43 = vmul.f32 %v75_v25, %v761_v27  ;;  %v92_v44 = vmul.f32 %v75_v25, %v763_v28 }
  0x9b   :  { %v93_v37 = vadd.f32 %v79_v29, %v77_v20  ;;  %v102_v38 = vadd.f32 %v80_v30, %v78_v21  ;;  %v111_v39 = vadd.f32 %v87_v31, %v85_v22  ;;  %v120_v40 = vadd.f32 %v88_v32, %v86_v23 }
  0x9d   :  { %v94_v45 = vadd.f32 %v93_v37, %v81_v33  ;;  %v103_v46 = vadd.f32 %v102_v38, %v82_v34  ;;  %v112_v47 = vadd.f32 %v111_v39, %v89_v35  ;;  %v121_v48 = vadd.f32 %v120_v40, %v90_v36 }
  0x9f   :  { %v95_v49 = vadd.f32 %v94_v45, %v83_v41  ;;  %v104_v50 = vadd.f32 %v103_v46, %v84_v42  ;;  %v113_v51 = vadd.f32 %v112_v47, %v91_v43  ;;  %v122_v52 = vadd.f32 %v121_v48, %v92_v44 }
  0xa0   :  { %v176_v42 = vlaneseq }
  0xa1   :  { %v96_v53 = vrot.slane %v95_v49, 4  ;;  %v105_v54 = vrot.slane %v104_v50, 4  ;;  %v114_v55 = vrot.slane %v113_v51, 4  ;;  %v123_v56 = vrot.slane %v122_v52, 4 }
  0xa2   :  { %v782_v45 = vshrl.u32 %v176_v42, 7 }
  0xa3   :  { %v97_v57 = vadd.f32 %v96_v53, %v95_v49  ;;  %v106_v58 = vadd.f32 %v105_v54, %v104_v50  ;;  %v115_v59 = vadd.f32 %v114_v55, %v113_v51  ;;  %v124_v60 = vadd.f32 %v123_v56, %v122_v52 }
  0xa4   :  { %v785_v46 = vsub.s32 0, %v782_v45 }
  0xa5   :  { %v98_v61 = vrot.slane %v97_v57, 2  ;;  %v107_v62 = vrot.slane %v106_v58, 2  ;;  %v116_v63 = vrot.slane %v115_v59, 2  ;;  %v125_v0 = vrot.slane %v124_v60, 2 }
  0xa7   :  { %v99_v1 = vadd.f32 %v98_v61, %v97_v57  ;;  %v108_v2 = vadd.f32 %v107_v62, %v106_v58  ;;  %v117_v3 = vadd.f32 %v116_v63, %v115_v59  ;;  %v126_v4 = vadd.f32 %v125_v0, %v124_v60 }
  0xa9   :  { %v100_v5 = vrot.slane %v99_v1, 1  ;;  %v109_v6 = vrot.slane %v108_v2, 1  ;;  %v118_v19 = vrot.slane %v117_v3, 1  ;;  %v127_v20 = vrot.slane %v126_v4, 1 }
  0xab   :  { %v101_v21 = vadd.f32 %v100_v5, %v99_v1  ;;  %v110_v22 = vadd.f32 %v109_v6, %v108_v2  ;;  %v119_v23 = vadd.f32 %v118_v19, %v117_v3  ;;  %v128_v25 = vadd.f32 %v127_v20, %v126_v4 }
  0xad   :  { %v134_v29 = vsel %vm133_vm0, %v119_v23, %v101_v21  ;;  %v135_v30 = vsel %vm133_vm0, %v128_v25, %v110_v22 }
  0xae   :  { %v139_v31 = vsel %vm138_vm1, %v134_v29, -inf  ;;  %v140_v32 = vsel %vm138_vm1, %v135_v30, -inf }
  0xaf   :  { %v141_v33 = vmax.f32 %v139_v31, %v140_v32 }
  0xb1   :  { %142 = vmax.xlane.f32.xlu0 %v141_v33 }
 0x13e   :  { %v143_v34 = vpop.xlane.xlu0 %142 }
 0x13f   :  { %v145_v35 = vrot.slane %v143_v34, 1  ;;  %v148_v36 = vsub.f32 %v101_v21, %v143_v34  ;;  %v149_v37 = vsub.f32 %v110_v22, %v143_v34 }
 0x141   :  { %v150_v38 = vsub.f32 %v119_v23, %v145_v35  ;;  %v151_v39 = vsub.f32 %v128_v25, %v145_v35  ;;  %v152_v40 = vmul.f32 1.442695, %v148_v36  ;;  %v154_v41 = vmul.f32 1.442695, %v149_v37 }
 0x143   :  { %611 = vpow2.f32 %v152_v40  ;;  %v156_v43 = vmul.f32 1.442695, %v150_v38  ;;  %v158_v44 = vmul.f32 1.442695, %v151_v39 }
 0x144   :  { %613 = vpow2.f32 %v154_v41 }
 0x145   :  { %615 = vpow2.f32 %v156_v43 }
 0x146   :  { %617 = vpow2.f32 %v158_v44  ;;  %v239_v44 = vsub.s32 1, %v782_v45 }
 0x14d   :  { %v612_v47 = vpop.eup %611 }
 0x14e   :  { %v614_v48 = vpop.eup %613  ;;  %v179_v49 = vrot.slane %v612_v47, %v785_v46 }
 0x14f   :  { %v616_v50 = vpop.eup %615  ;;  %v183_v51 = vrot.slane %v614_v48, %v785_v46 }
 0x150   :  { %v618_v52 = vpop.eup %617  ;;  %v192_v53 = vmul.f32 %v179_v49, %v729_v7  ;;  %v164_v54 = vrot.slane %v616_v50, 7  ;;  %v194_v58 = vmul.f32 %v179_v49, %v739_v12  ;;  %v187_v60 = vrot.slane %v616_v50, %v785_v46 }
 0x151   :  { %v193_v55 = vmul.f32 %v183_v51, %v731_v8  ;;  %v166_v56 = vrot.slane %v618_v52, 7  ;;  %v195_v59 = vmul.f32 %v183_v51, %v741_v13  ;;  %v191_v0 = vrot.slane %v618_v52, %v785_v46 }
 0x152   :  { %v165_v57 = vsel %vm133_vm0, %v164_v54, %v612_v47  ;;  %v196_v3 = vmul.f32 %v179_v49, %v733_v9  ;;  %v197_v4 = vmul.f32 %v183_v51, %v747_v16  ;;  %v202_v6 = vmul.f32 %v187_v60, %v743_v14 }
 0x153   :  { %v208_v61 = vadd.f32 %v193_v55, %v192_v53  ;;  %v167_v62 = vsel %vm133_vm0, %v166_v56, %v614_v48  ;;  %v170_v63 = vsel %vm138_vm1, %v165_v57, 0.0  ;;  %v211_v5 = vadd.f32 %v195_v59, %v194_v58 }
 0x154   :  { %v171_v1 = vsel %vm138_vm1, %v167_v62, 0.0  ;;  %v203_v19 = vmul.f32 %v191_v0, %v745_v15  ;;  %v214_v20 = vadd.f32 %v197_v4, %v196_v3  ;;  %v200_v21 = vmul.f32 %v187_v60, %v735_v10  ;;  %v52_v62 = vld [vmem:[%s872_s2] sm:$0xff]  ;;  %v55_v3 = vld [vmem:[%s872_s2 + $0x18] sm:$0xff] }
 0x155   :  { %209 = vadd.xlane.f32.xlu0 %v208_v61  ;;  %v172_v2 = vadd.f32 %v171_v1, %v170_v63  ;;  %v201_v22 = vmul.f32 %v191_v0, %v737_v11  ;;  %v204_v25 = vmul.f32 %v187_v60, %v749_v17  ;;  %v205_v29 = vmul.f32 %v191_v0, %v751_v18  ;;  %v53_v63 = vld [vmem:[%s872_s2 + $0x8] sm:$0xff] }
 0x156   :  { %v223_v23 = vadd.f32 %v203_v19, %v202_v6  ;;  %v198_v31 = vmul.f32 %v179_v49, %v757_v24  ;;  %v199_v32 = vmul.f32 %v183_v51, %v759_v26  ;;  %v206_v34 = vmul.f32 %v187_v60, %v761_v27 }
 0x157   :  { %173 = vadd.xlane.f32.xlu1 %v172_v2  ;;  %v220_v30 = vadd.f32 %v201_v22, %v200_v21  ;;  %v226_v33 = vadd.f32 %v205_v29, %v204_v25  ;;  %v207_v35 = vmul.f32 %v191_v0, %v763_v28  ;;  %v673_v0 = vmov 0.0|0.0   ;;  %v54_v2 = vld [vmem:[%s872_s2 + $0x10] sm:$0xff] }
 0x158   :  { %v217_v36 = vadd.f32 %v199_v32, %v198_v31  ;;  %595 = vmatprep.subr.bf16.mxu0 %v673_v0  ;;  %v596_v1 = vpack.c.bf16 %v53_v63, %v52_v62  ;;  %v599_v4 = vpack.c.bf16 %v55_v3, %v54_v2 }
 0x159   :  { %212 = vadd.xlane.f32.xlu0 %v211_v5  ;;  %v229_v37 = vadd.f32 %v207_v35, %v206_v34  ;;  %v675_v5 = vmov 0.0  }
 0x15a   :  { %597 = vmatpush3.bf16.msra.mxu0 %v596_v1  ;;  %587 = vmatprep.mubr.msk.f32.mxu0 %vm674_vm2, %v675_v5 }
 0x15b   :  { %215 = vadd.xlane.f32.xlu1 %v214_v20  ;;  %598 = vmatprep.subr.bf16.mxu0 %v673_v0  ;;  %v284_v20 = vand.u32 127, %v176_v42 }
 0x15c   :  { %590 = vmatprep.subr.mxu1 %v675_v5  ;;  %592 = vmatprep.mubr.msk.f32.mxu1 %vm674_vm2, %v675_v5 }
 0x15d   :  { %224 = vadd.xlane.f32.xlu0 %v223_v23  ;;  %v289_v22 = vadd.s32 4294967288, %v284_v20  ;;  %v296_v23 = vadd.s32 4294967280, %v284_v20  ;;  %v303_v29 = vadd.s32 4294967272, %v284_v20  ;;  %v287_v32 = vsub.s32 %v284_v20, %v782_v45 }
 0x15e   :  { %600 = vmatpush3.bf16.msra.mxu0 %v599_v4 }
 0x15f   :  { %221 = vadd.xlane.f32.xlu1 %v220_v30  ;;  %v292_v31 = vsub.s32 %v289_v22, %v782_v45  ;;  %v306_v34 = vsub.s32 %v303_v29, %v782_v45 }
 0x161   :  { %227 = vadd.xlane.f32.xlu0 %v226_v33  ;;  %v299_v33 = vsub.s32 %v296_v23, %v782_v45 }
 0x163   :  { %218 = vadd.xlane.f32.xlu1 %v217_v36 }
 0x165   :  { %230 = vadd.xlane.f32.xlu0 %v229_v37 }
 0x1e2   :  { %v210_v39 = vpop.xlane.xlu0 %209 }
 0x1e4   :  { %v174_v38 = vpop.xlane.xlu1 %173 }
 0x1e5   :  { %619 = vrcp.f32 %v174_v38 }
 0x1e6   :  { %v213_v41 = vpop.xlane.xlu0 %212 }
 0x1e8   :  { %v216_v40 = vpop.xlane.xlu1 %215 }
 0x1ea   :  { %v225_v52 = vpop.xlane.xlu0 %224 }
 0x1ec   :  { %v222_v48 = vpop.xlane.xlu1 %221 }
 0x1ee   :  { %v228_v56 = vpop.xlane.xlu0 %227 }
 0x1ef   :  { %v620_v43 = vpop.eup %619 }
 0x1f0   :  { %v236_v47 = vrot.slane %v620_v43, %v785_v46  ;;  %v240_v50 = vrot.slane %v620_v43, %v239_v44  ;;  %v219_v55 = vpop.xlane.xlu1 %218 }
 0x1f2   :  { %v244_v49 = vmul.f32 %v236_v47, %v213_v41  ;;  %v243_v51 = vmul.f32 %v236_v47, %v210_v39  ;;  %v245_v53 = vmul.f32 %v236_v47, %v216_v40  ;;  %v247_v54 = vmul.f32 %v240_v50, %v222_v48  ;;  %v231_v60 = vpop.xlane.xlu0 %230 }
 0x1f3   :  { %v246_v57 = vmul.f32 %v236_v47, %v219_v55  ;;  %v248_v58 = vmul.f32 %v240_v50, %v225_v52  ;;  %v249_v59 = vmul.f32 %v240_v50, %v228_v56  ;;  %v250_v61 = vmul.f32 %v240_v50, %v231_v60  ;;  %v56_v56 = vld [vmem:[%s873_s3] sm:$0xf]  ;;  %s676_s3 = smov [#allocation5]  }
 0x1f4   :  { %263 = vperm.xlu0 %609, %v244_v49   ;;  %260 = vperm.xlu1 %610, %v243_v51   ;;  %s557_s18 = sshll.u32 %s676_s3, 4  ;;  %s558_s18 = int_to_ptr.vmem [resolvable:$true] %s557_s18 }
 0x1f5   :  { %591 = vmatpush3.msk.msra.mxu1 %vm408_vm7, %v56_v56  ;;  %s643_s19 = scalar_lea.vmem %s558_s18, 2048  ;;  %p648_p9 = scmp.lt.s32.totalorder %s558_s18, %s558_s18 }
 0x1f6   :  { %p644_p8 = scmp.ne.s32.totalorder %s558_s18, %s643_s19  ;;  %p649_p10 = scmp.lt.s32.totalorder %s643_s19, %s643_s19 }
 0x1f8   :  { %266 = vperm.xlu0 %609, %v245_v53   ;;  %272 = vperm.xlu1 %610, %v247_v54   ;;  %p650_p11 = por %p649_p10, %p648_p9 }
 0x1fa   :  { %p651_p12 = pnand %p650_p11, %p644_p8 }
 0x1fc   :  { %269 = vperm.xlu0 %609, %v246_v57   ;;  %275 = vperm.xlu1 %610, %v248_v58  }
 0x200   :  { %278 = vperm.xlu1 %610, %v249_v59  }
 0x204   :  { %281 = vperm.xlu1 %610, %v250_v61  }
 0x273   :  { %v264_v6 = vpop.permute.xlu0 %263  ;;  %v261_v19 = vpop.permute.xlu1 %260 }
 0x274   :  { %v293_v37 = vrot.slane %v264_v6, %v292_v31  ;;  %v288_v38 = vrot.slane %v261_v19, %v287_v32 }
 0x276   :  { %v295_v48 = vsel %vm294_vm3, %v293_v37, %v288_v38 }
 0x277   :  { %v273_v21 = vpop.permute.xlu1 %272  ;;  %v267_v25 = vpop.permute.xlu0 %266 }
 0x278   :  { %v300_v42 = vrot.slane %v267_v25, %v299_v33  ;;  %v313_v41 = vrot.slane %v273_v21, %v287_v32 }
 0x27a   :  { %v302_v51 = vsel %vm301_vm4, %v300_v42, %v295_v48 }
 0x27b   :  { %v276_v30 = vpop.permute.xlu1 %275  ;;  %v270_v35 = vpop.permute.xlu0 %269 }
 0x27c   :  { %v317_v39 = vrot.slane %v276_v30, %v292_v31  ;;  %v307_v43 = vrot.slane %v270_v35, %v306_v34 }
 0x27e   :  { %v318_v49 = vsel %vm294_vm3, %v317_v39, %v313_v41  ;;  %v309_v53 = vsel %vm308_vm5, %v307_v43, %v302_v51 }
 0x27f   :  { %v279_v36 = vpop.permute.xlu1 %278 }
 0x280   :  { %v322_v40 = vrot.slane %v279_v36, %v299_v33 }
 0x282   :  { %v323_v52 = vsel %vm301_vm4, %v322_v40, %v318_v49 }
 0x283   :  { %v282_v47 = vpop.permute.xlu1 %281 }
 0x284   :  { %v327_v50 = vrot.slane %v282_v47, %v306_v34 }
 0x286   :  { %v328_v54 = vsel %vm308_vm5, %v327_v50, %v323_v52 }
 0x287   :  { %v329_v55 = vsel %vm133_vm0, %v328_v54, %v309_v53 }
 0x288   :  { %588 = vmatmul.mubr.msk.f32.vlgmr.msra.gmra.mrb[0].mxu0 %vm330_vm6, %v329_v55 }
 0x35b   :  { %v399_v57 = vpop.f32.mrb[0].mxu0 }
 0x35c   :  { %v403_v58 = vmax.f32 %v399_v57, 0.0  ;;  %v589_v59 = vpop.f32.mrb[1].mxu0 }
 0x35e   :  { %593 = vmatmul.mubr.msk.f32.vlgmr.msra.gmra.mrb[0].mxu1 %vm404_vm8, %v403_v58 }
 0x431   :  { %v478_v60 = vpop.f32.mrb[0].mxu1 }
 0x432   :  { %v485_v61 = vrot.slane %v478_v60, %v785_v46  ;;  %v594_v62 = vpop.f32.mrb[1].mxu1  ;;  %v504_v63 = vrot.slane %v478_v60, %v239_v44 }
 0x434   :  { %491 = vbcast.lane.b32.xlu1 %v485_v61, 264  ;;  %487 = vbcast.lane.b32.xlu0 %v485_v61, 256 }
 0x438   :  { %499 = vbcast.lane.b32.xlu1 %v485_v61, 280  ;;  %495 = vbcast.lane.b32.xlu0 %v485_v61, 272 }
 0x43c   :  { %510 = vbcast.lane.b32.xlu1 %v504_v63, 264  ;;  %506 = vbcast.lane.b32.xlu0 %v504_v63, 256 }
 0x440   :  { %518 = vbcast.lane.b32.xlu1 %v504_v63, 280  ;;  %514 = vbcast.lane.b32.xlu0 %v504_v63, 272 }
 0x4a6   :  { %v492_v0 = vpop.permute.xlu1 %491  ;;  %v488_v1 = vpop.permute.xlu0 %487 }
 0x4a7   :  { %v522_v2 = vadd.f32 %v492_v0, %v739_v12  ;;  %v523_v3 = vadd.f32 %v492_v0, %v741_v13  ;;  %v520_v46 = vadd.f32 %v488_v1, %v729_v7  ;;  %v521_v4 = vadd.f32 %v488_v1, %v731_v8 }
 0x4a9   :  { %538 = vst [vmem:[#allocation5 + $0x10] sm:$0xff] %v522_v2  ;;  %539 = vst [vmem:[#allocation5 + $0x18] sm:$0xff] %v523_v3 }
 0x4aa   :  { %536 = vst [vmem:[#allocation5] sm:$0xff] %v520_v46  ;;  %537 = vst [vmem:[#allocation5 + $0x8] sm:$0xff] %v521_v4  ;;  %v500_v45 = vpop.permute.xlu1 %499  ;;  %v496_v44 = vpop.permute.xlu0 %495 }
 0x4ab   :  { %v526_v5 = vadd.f32 %v500_v45, %v757_v24  ;;  %v527_v6 = vadd.f32 %v500_v45, %v759_v26  ;;  %v524_v19 = vadd.f32 %v496_v44, %v733_v9  ;;  %v525_v12 = vadd.f32 %v496_v44, %v747_v16 }
 0x4ad   :  { %542 = vst [vmem:[#allocation5 + $0x30] sm:$0xff] %v526_v5  ;;  %543 = vst [vmem:[#allocation5 + $0x38] sm:$0xff] %v527_v6 }
 0x4ae   :  { %540 = vst [vmem:[#allocation5 + $0x20] sm:$0xff] %v524_v19  ;;  %541 = vst [vmem:[#allocation5 + $0x28] sm:$0xff] %v525_v12  ;;  %v511_v7 = vpop.permute.xlu1 %510  ;;  %v507_v8 = vpop.permute.xlu0 %506 }
 0x4af   :  { %v530_v13 = vadd.f32 %v511_v7, %v743_v14  ;;  %v531_v20 = vadd.f32 %v511_v7, %v745_v15  ;;  %v528_v21 = vadd.f32 %v507_v8, %v735_v10  ;;  %v529_v24 = vadd.f32 %v507_v8, %v737_v11 }
 0x4b1   :  { %546 = vst [vmem:[#allocation5 + $0x50] sm:$0xff] %v530_v13  ;;  %547 = vst [vmem:[#allocation5 + $0x58] sm:$0xff] %v531_v20 }
 0x4b2   :  { %544 = vst [vmem:[#allocation5 + $0x40] sm:$0xff] %v528_v21  ;;  %545 = vst [vmem:[#allocation5 + $0x48] sm:$0xff] %v529_v24  ;;  %v519_v9 = vpop.permute.xlu1 %518  ;;  %v515_v16 = vpop.permute.xlu0 %514 }
 0x4b3   :  { %v534_v26 = vadd.f32 %v519_v9, %v761_v27  ;;  %v535_v22 = vadd.f32 %v519_v9, %v763_v28  ;;  %v532_v14 = vadd.f32 %v515_v16, %v749_v17  ;;  %v533_v15 = vadd.f32 %v515_v16, %v751_v18 }
 0x4b5   :  { %550 = vst [vmem:[#allocation5 + $0x70] sm:$0xff] %v534_v26  ;;  %551 = vst [vmem:[#allocation5 + $0x78] sm:$0xff] %v535_v22 }
 0x4b6   :  { %548 = vst [vmem:[#allocation5 + $0x60] sm:$0xff] %v532_v14  ;;  %549 = vst [vmem:[#allocation5 + $0x68] sm:$0xff] %v533_v15 }
 0x4b7   :  { %654 = shalt.err (!%p651_p12)
}
 0x4b8   :  { %s655_s22 = scalar_lea.hbm %s874_s4, 2048 }
 0x4b9   :  { %p656_p13 = scmp.ne.s32.totalorder %s874_s4, %s655_s22  ;;  %p659_p0 = scmp.lt.u32.totalorder %s655_s22, %s874_s4 }
 0x4bb   :  { %p661_p1 = pnand %p659_p0, %p656_p13 }
 0x4bd   :  { %664 = shalt.err (!%p661_p1)
}
 0x4be   :  { %563 = dma.vmem_to_hbm [thread:$0]  %s558_s18, 2048, %s874_s4, [#allocation4], %s670_s25, %s670_s25, %s671_s26  }
 0x4bf   :  { %667 = dma.done.wait [#allocation4], 2048  }
 0x4c0   :  { %668 = vsyncadd [#allocation4], 4294965248 }
 0x4c1   :  { %567 = vsyncpa [#allocation3], 1 }
 0x4c2   :  { %568 = vsyncpa [#allocation4], 1 }

</bundles_post_ra>
